<compile_context>
chip_gen: v7x
topology: tpu7x:2x2x1
jax: 0.10.0
libtpu: 0.0.40
codegen_flags: <defaults>
</compile_context>

<pallas_src>
import math
import functools

import jax
import jax.numpy as jnp
from jax.experimental import pallas as pl
from jax.experimental.pallas import tpu as pltpu


def _build_pos_encoding(max_len: int, modeldim: int, dtype=jnp.float32) -> jnp.ndarray:
    """Deterministic sin/cos table, identical to the PyTorch __init__ (as (L, D))."""
    positions = jnp.arange(0, max_len, dtype=jnp.float32).reshape(-1, 1)         # (L, 1)
    division_term = jnp.exp(
        jnp.arange(0, modeldim, 2, dtype=jnp.float32) * (-math.log(10000.0) / modeldim)
    )                                                                             # (D/2,)
    pe = jnp.zeros((max_len, modeldim), dtype=jnp.float32)
    pe = pe.at[:, 0::2].set(jnp.sin(positions * division_term))
    pe = pe.at[:, 1::2].set(jnp.cos(positions * division_term))
    return pe.astype(dtype)


def _pe_add_kernel(x_ref, pe_ref, o_ref):
    # x_ref: (tile_s, B, D); pe_ref: (tile_s, 1, D).
    # The (1 -> B) broadcast along the second-to-last axis is a cheap sublane
    # broadcast on the VPU; no extra HBM traffic, no MXU.
    o_ref[...] = (x_ref[...] + pe_ref[...]).astype(o_ref.dtype)
    # Eval-mode dropout is identity -> nothing more to do.


def _pick_tile_seq(seq: int, batch: int, modeldim: int, itemsize: int) -> int:
    """Largest seq-tile such that ~4 live (tile_s, B, D) buffers (double-buffered
    x + out; pe is negligible) stay under ~12 MiB, using layout-padded sizes
    (sublane tile = 32/itemsize, lane tile = 128). Capped at 512 rows."""
    sub_mult = max(8, 32 // itemsize)                       # 8 for f32, 16 for bf16, 32 for i8
    pad_b = -(-batch // sub_mult) * sub_mult
    pad_d = -(-modeldim // 128) * 128
    bytes_per_seq_row = pad_b * pad_d * itemsize
    budget_bytes = 12 * 1024 * 1024
    max_rows = max(1, budget_bytes // (4 * bytes_per_seq_row))
    return max(1, min(seq, 512, max_rows))


def _pe_add_pallas(x: jnp.ndarray, pe3: jnp.ndarray) -> jnp.ndarray:
    S, B, D = x.shape
    tile_s = _pick_tile_seq(S, B, D, x.dtype.itemsize)
    grid = (pl.cdiv(S, tile_s),)

    return pl.pallas_call(
        _pe_add_kernel,
        out_shape=jax.ShapeDtypeStruct((S, B, D), x.dtype),
        grid_spec=pltpu.PrefetchScalarGridSpec(
            num_scalar_prefetch=0,
            grid=grid,
            in_specs=[
                pl.BlockSpec((tile_s, B, D), lambda i: (i, 0, 0)),
                pl.BlockSpec((tile_s, 1, D), lambda i: (i, 0, 0)),
            ],
            out_specs=pl.BlockSpec((tile_s, B, D), lambda i: (i, 0, 0)),
        ),
        compiler_params=pltpu.CompilerParams(
            dimension_semantics=("parallel",),      # independent seq tiles; shards across v7x TCs
            vmem_limit_bytes=32 * 1024 * 1024,      # > v5e 16 MiB default, < v7x 64 MiB physical
        ),
        input_output_aliases={0: 0},                # output reuses the x buffer
    )(x, pe3)


@functools.partial(jax.jit, static_argnames=("use_pallas",))
def positional_encoding_forward(token_embedding: jnp.ndarray,
                                pos_encoding: jnp.ndarray,
                                use_pallas: bool | None = None) -> jnp.ndarray:
    """token_embedding: (S, B, D); pos_encoding: (max_len, D).

    use_pallas: True  -> always run the Pallas kernel
                False -> plain fused XLA add
                None  -> auto: fall back to XLA for tiny inputs where the
                         pallas_call fixed overhead dominates.
    """
    S, B, D = token_embedding.shape
    max_len = pos_encoding.shape[0]
    if S > max_len:
        raise ValueError(f"seq_len {S} exceeds max_len {max_len} of the positional encoding")

    # Buffer slice + dtype match + (S, 1, D) view for in-kernel batch broadcast.
    pe3 = pos_encoding[:S, :].astype(token_embedding.dtype).reshape(S, 1, D)

    if use_pallas is None:
        use_pallas = token_embedding.size >= 64 * 1024   # tiny inputs: kernel is pure overhead

    if not use_pallas:
        return token_embedding + pe3

    return _pe_add_pallas(token_embedding, pe3)


if __name__ == "__main__":
    # Module config (synthetic, deterministic)
    modeldim = 32
    max_len = 16
    dropout_p = 0.1   # eval-mode dropout == identity

    # Forward input: token_embedding of shape (seq, batch, modeldim)
    seq, batch = 8, 2
    key = jax.random.PRNGKey(0)
    token_embedding = jax.random.normal(key, (seq, batch, modeldim), dtype=jnp.float32)

    pos_encoding = _build_pos_encoding(max_len, modeldim)                      # (max_len, modeldim)

    # Force the Pallas path so the kernel is exercised even at demo shapes
    # (the auto-dispatch would pick the plain XLA add here).
    out = positional_encoding_forward(token_embedding, pos_encoding, use_pallas=True)
    out = jax.block_until_ready(out)

    # Pure-JAX reference check (eval-mode forward).
    ref = token_embedding + pos_encoding[:seq, :][:, None, :]
    assert out.shape == (seq, batch, modeldim)
    assert jnp.allclose(out, ref, atol=1e-6, rtol=1e-6), "mismatch vs reference"

    print("KERNEL_OK")
</pallas_src>

<mosaic_0001>
module attributes {stable_mosaic.version = 11 : i64} {
  func.func @_pe_add_kernel(%arg0: i32, %arg1: memref<8x2x32xf32, #tpu.memory_space<vmem>>, %arg2: memref<8x1x32xf32, #tpu.memory_space<vmem>>, %arg3: memref<8x2x32xf32, #tpu.memory_space<vmem>>) attributes {dimension_semantics = [#tpu.dimension_semantics<parallel>], iteration_bounds = array<i64: 1>, scalar_prefetch = 0 : i64, scratch_operands = 0 : i64, tpu.core_type = #tpu.core_type<tc>, window_params = [{transform_indices = @transform_0, window_bounds = array<i64: 8, 2, 32>}, {transform_indices = @transform_1, window_bounds = array<i64: 8, 1, 32>}, {transform_indices = @transform_2, window_bounds = array<i64: 8, 2, 32>}]} {
    %c0 = arith.constant 0 : index
    %c0_0 = arith.constant 0 : index
    %c0_1 = arith.constant 0 : index
    %0 = vector.load %arg1[%c0, %c0_0, %c0_1] : memref<8x2x32xf32, #tpu.memory_space<vmem>>, vector<8x2x32xf32>
    %c0_2 = arith.constant 0 : index
    %c0_3 = arith.constant 0 : index
    %c0_4 = arith.constant 0 : index
    %1 = vector.load %arg2[%c0_2, %c0_3, %c0_4] : memref<8x1x32xf32, #tpu.memory_space<vmem>>, vector<8x1x32xf32>
    %2 = vector.broadcast %1 : vector<8x1x32xf32> to vector<8x2x32xf32>
    %3 = arith.addf %0, %2 : vector<8x2x32xf32>
    %c0_5 = arith.constant 0 : index
    %c0_6 = arith.constant 0 : index
    %c0_7 = arith.constant 0 : index
    %4 = vector.load %arg3[%c0_5, %c0_6, %c0_7] : memref<8x2x32xf32, #tpu.memory_space<vmem>>, vector<8x2x32xf32>
    tpu.vector_store %arg3[%c0_5, %c0_6, %c0_7], %3 {strides = array<i32>} : memref<8x2x32xf32, #tpu.memory_space<vmem>>, vector<8x2x32xf32>,
    return
  }
  func.func @transform_0(%arg0: i32) -> (i32, i32, i32) {
    %c0_i32 = arith.constant 0 : i32
    %c0_i32_0 = arith.constant 0 : i32
    %c0_i32_1 = arith.constant 0 : i32
    return %arg0, %c0_i32, %c0_i32_0 : i32, i32, i32
  }
  func.func @transform_1(%arg0: i32) -> (i32, i32, i32) {
    %c0_i32 = arith.constant 0 : i32
    %c0_i32_0 = arith.constant 0 : i32
    %c0_i32_1 = arith.constant 0 : i32
    return %arg0, %c0_i32, %c0_i32_0 : i32, i32, i32
  }
  func.func @transform_2(%arg0: i32) -> (i32, i32, i32) {
    %c0_i32 = arith.constant 0 : i32
    %c0_i32_0 = arith.constant 0 : i32
    %c0_i32_1 = arith.constant 0 : i32
    return %arg0, %c0_i32, %c0_i32_0 : i32, i32, i32
  }
}

</mosaic_0001>

<bundles_post_ra>
// kernel: positional_encoding_forward.1
= control target key start
LH: loop header
LB: loop body
LE: loop exit
PB: predicated region body
PF: predicated region fallthrough
CT: control target
= control target key end

     0   :  { %7 = vsyncpa [#allocation3], 0  ;;  %s268_s0 = inlined_call_operand.hbm [shape: f32[8,2,32], index: 0, kind: input, shape index: {}, may-alias: {0,2}]   ;;  %s269_s1 = inlined_call_operand.vmem [shape: f32[8,1,32], index: 1, kind: input, shape index: {}]   ;;  %s270_s2 = inlined_call_operand.hbm [shape: f32[8,2,32], index: 2, kind: output, shape index: {}, may-alias: {0,2}]  }
   0x1   :  { %8 = vsyncpa [#allocation4], 0  ;;  %s184_s9 = smov [#allocation2]   ;;  %s136_s13 = scalar_lea.hbm %s268_s0, 256 }
   0x2   :  { %s14_s10 = sshll.u32 %s184_s9, 4  ;;  %p137_p0 = scmp.ne.s32.totalorder %s268_s0, %s136_s13  ;;  %s15_s10 = int_to_ptr.vmem [resolvable:$true] %s14_s10 }
   0x3   :  { %p140_p1 = scmp.lt.u32.totalorder %s136_s13, %s268_s0 }
   0x5   :  { %p142_p2 = pnand %p140_p1, %p137_p0 }
   0x7   :  { %145 = shalt.err (!%p142_p2)
}
   0x8   :  { %s146_s18 = scalar_lea.vmem %s15_s10, 256  ;;  %p151_p4 = scmp.lt.s32.totalorder %s15_s10, %s15_s10 }
   0x9   :  { %p147_p3 = scmp.ne.s32.totalorder %s15_s10, %s146_s18  ;;  %p152_p5 = scmp.lt.s32.totalorder %s146_s18, %s146_s18 }
   0xb   :  { %p153_p6 = por %p152_p5, %p151_p4 }
   0xd   :  { %p154_p7 = pnand %p153_p6, %p147_p3 }
   0xf   :  { %157 = shalt.err (!%p154_p7)
}
  0x10   :  { %s185_s19 = smov 32   ;;  %s186_s20 = smov 2  }
  0x11   :  { %20 = dma.hbm_to_vmem [thread:$0]  %s268_s0, 256, %s15_s10, [#allocation3], %s185_s19, %s185_s19, %s186_s20  }
  0x12   :  { %180 = dma.done.wait [#allocation3], 256  }
  0x13   :  { %181 = vsyncadd [#allocation3], 4294967040  ;;  %vm98_vm0 = vcmask 254976   ;;  %s187_s23 = smov [#allocation5]   ;;  %v26_v0 = vld [vmem:[#allocation2] sm:$0x3] }
  0x14   :  { %s218_s24 = sshll.u32 %s187_s23, 4  ;;  %v124_v1 = vld [vmem:[%s269_s1] ss:$0 sm:$0xff]  ;;  %v27_v2 = vld [vmem:[#allocation2 + $0x2] sm:$0x3]  ;;  %s113_s24 = int_to_ptr.vmem [resolvable:$true] %s218_s24 }
  0x15   :  { %v90_v3 = vadd.f32 %v124_v1, %v26_v0  ;;  %v125_v4 = vld [vmem:[%s269_s1 + $0x1] ss:$0 sm:$0xff]  ;;  %v28_v5 = vld [vmem:[#allocation2 + $0x4] sm:$0x3]  ;;  %v126_v6 = vld [vmem:[%s269_s1 + $0x2] ss:$0 sm:$0xff]  ;;  %p163_p9 = scmp.lt.s32.totalorder %s113_s24, %s113_s24 }
  0x16   :  { %v91_v7 = vadd.f32 %v125_v4, %v27_v2  ;;  %v92_v8 = vadd.f32 %v126_v6, %v28_v5  ;;  %v29_v9 = vld [vmem:[#allocation2 + $0x6] sm:$0x3]  ;;  %v127_v10 = vld [vmem:[%s269_s1 + $0x3] ss:$0 sm:$0xff]  ;;  %v30_v11 = vld [vmem:[#allocation2 + $0x8] sm:$0x3] }
  0x17   :  { %99 = vst.msk [vmem:[#allocation5] sm:$0x3] %vm98_vm0, %v90_v3  ;;  %v93_v12 = vadd.f32 %v127_v10, %v29_v9  ;;  %v128_v13 = vld [vmem:[%s269_s1 + $0x4] ss:$0 sm:$0xff]  ;;  %v31_v14 = vld [vmem:[#allocation2 + $0xa] sm:$0x3] }
  0x18   :  { %v129_v15 = vld [vmem:[%s269_s1 + $0x5] ss:$0 sm:$0xff]  ;;  %100 = vst.msk [vmem:[#allocation5 + $0x2] sm:$0x3] %vm98_vm0, %v91_v7  ;;  %101 = vst.msk [vmem:[#allocation5 + $0x4] sm:$0x3] %vm98_vm0, %v92_v8  ;;  %v94_v16 = vadd.f32 %v128_v13, %v30_v11 }
  0x19   :  { %v95_v17 = vadd.f32 %v129_v15, %v31_v14  ;;  %v32_v18 = vld [vmem:[#allocation2 + $0xc] sm:$0x3]  ;;  %v130_v19 = vld [vmem:[%s269_s1 + $0x6] ss:$0 sm:$0xff]  ;;  %v33_v20 = vld [vmem:[#allocation2 + $0xe] sm:$0x3] }
  0x1a   :  { %102 = vst.msk [vmem:[#allocation5 + $0x6] sm:$0x3] %vm98_vm0, %v93_v12  ;;  %v96_v21 = vadd.f32 %v130_v19, %v32_v18  ;;  %v131_v22 = vld [vmem:[%s269_s1 + $0x7] ss:$0 sm:$0xff]  ;;  %103 = vst.msk [vmem:[#allocation5 + $0x8] sm:$0x3] %vm98_vm0, %v94_v16 }
  0x1b   :  { %104 = vst.msk [vmem:[#allocation5 + $0xa] sm:$0x3] %vm98_vm0, %v95_v17  ;;  %v97_v23 = vadd.f32 %v131_v22, %v33_v20  ;;  %s158_s12 = scalar_lea.vmem %s113_s24, 256 }
  0x1c   :  { %105 = vst.msk [vmem:[#allocation5 + $0xc] sm:$0x3] %vm98_vm0, %v96_v21  ;;  %p159_p8 = scmp.ne.s32.totalorder %s113_s24, %s158_s12  ;;  %p164_p10 = scmp.lt.s32.totalorder %s158_s12, %s158_s12 }
  0x1d   :  { %106 = vst.msk [vmem:[#allocation5 + $0xe] sm:$0x3] %vm98_vm0, %v97_v23 }
  0x1e   :  { %p165_p11 = por %p164_p10, %p163_p9 }
  0x20   :  { %p166_p12 = pnand %p165_p11, %p159_p8 }
  0x22   :  { %169 = shalt.err (!%p166_p12)
}
  0x23   :  { %s170_s1 = scalar_lea.hbm %s270_s2, 256 }
  0x24   :  { %p171_p13 = scmp.ne.s32.totalorder %s270_s2, %s170_s1  ;;  %p174_p0 = scmp.lt.u32.totalorder %s170_s1, %s270_s2 }
  0x26   :  { %p176_p1 = pnand %p174_p0, %p171_p13 }
  0x28   :  { %179 = shalt.err (!%p176_p1)
}
  0x29   :  { %118 = dma.vmem_to_hbm [thread:$0]  %s113_s24, 256, %s270_s2, [#allocation4], %s185_s19, %s185_s19, %s186_s20  }
  0x2a   :  { %182 = dma.done.wait [#allocation4], 256  }
  0x2b   :  { %183 = vsyncadd [#allocation4], 4294967040 }
  0x2c   :  { %122 = vsyncpa [#allocation3], 1 }
  0x2d   :  { %123 = vsyncpa [#allocation4], 1 }

</bundles_post_ra>
